<compile_context>
chip_gen: v7x
topology: tpu7x:2x2x1
jax: 0.10.0
libtpu: 0.0.40
codegen_flags: <defaults>
</compile_context>

<pallas_src>
import math
import functools

import numpy as np
import jax
import jax.numpy as jnp
from jax.experimental import pallas as pl
from jax.experimental.pallas import tpu as pltpu


_LANE = 128      # lane width: pad feature dims to multiples of this
_SUBLANE = 8     # sublane granularity for the batch tile


def _round_up(x, m):
    return ((x + m - 1) // m) * m


def _softplus(x):
    # Numerically stable softplus, matches torch.nn.Softplus semantics.
    return jnp.maximum(x, 0.0) + jnp.log1p(jnp.exp(-jnp.abs(x)))


def _gauss_policy_kernel(*refs, hidden_dims, with_layer_norm, action_dim,
                         sigma_lo, sigma_hi):
    # refs = obs_tile,
    #        (W_i, b_i [, gamma_i, beta_i]) for each hidden layer,
    #        W_head (fused mu|std, lane-padded), b_head,
    #        out_tile  ([TILE_B, HEAD_PAD]: cols [0,A)=mu, [A,2A)=sigma)
    idx = 0
    x = refs[idx][...]
    idx += 1

    for (h_true, h_pad) in hidden_dims:
        w_ref, b_ref = refs[idx], refs[idx + 1]
        idx += 2
        lhs = x if x.dtype == w_ref.dtype else x.astype(w_ref.dtype)
        x = jnp.dot(lhs, w_ref[...], preferred_element_type=jnp.float32)
        x = x + b_ref[...]
        if with_layer_norm:
            g_ref, beta_ref = refs[idx], refs[idx + 1]
            idx += 2
            inv_h = 1.0 / float(h_true)
            # Two-pass variance (matches the reference / torch.nn.LayerNorm);
            # sums are taken over padded lanes but divided by the true width,
            # and padded lanes are masked out of the centered term so they
            # contribute exactly zero.
            mean = jnp.sum(x, axis=-1, keepdims=True) * inv_h
            centered = x - mean
            if h_pad != h_true:
                lane = jax.lax.broadcasted_iota(jnp.int32, (1, h_pad), 1)
                centered = jnp.where(lane < h_true, centered, 0.0)
            var = jnp.sum(centered * centered, axis=-1, keepdims=True) * inv_h
            x = centered * jax.lax.rsqrt(var + 1e-5)
            x = x * g_ref[...] + beta_ref[...]   # zero-padded gamma/beta
        x = jnp.maximum(x, 0.0)  # ReLU; padded lanes stay exactly 0

    w_head_ref, b_head_ref, out_ref = refs[idx], refs[idx + 1], refs[idx + 2]
    lhs = x if x.dtype == w_head_ref.dtype else x.astype(w_head_ref.dtype)
    head = jnp.dot(lhs, w_head_ref[...], preferred_element_type=jnp.float32)
    head = head + b_head_ref[...]

    # Lane blocks [0, sig_start) hold only mu columns (only possible when
    # action_dim > 128): store them directly and skip the EUP softplus there.
    sig_start = (action_dim // _LANE) * _LANE
    if sig_start > 0:
        out_ref[:, :sig_start] = head[:, :sig_start].astype(out_ref.dtype)
        tail = head[:, sig_start:]
    else:
        tail = head

    sigma = _softplus(tail)
    if sigma_lo is not None and sigma_hi is not None:
        sigma = jnp.clip(sigma, sigma_lo, sigma_hi)

    # Single lane-dense fused store: mu in cols [0, A), sigma in [A, 2A);
    # padding lanes are don't-care (sliced off outside). The select mask is a
    # (1, width) iota row broadcast over the batch tile.
    col = jax.lax.broadcasted_iota(jnp.int32, (1, tail.shape[-1]), 1) + sig_start
    res = jnp.where(col < action_dim, tail, sigma)
    if sig_start > 0:
        out_ref[:, sig_start:] = res.astype(out_ref.dtype)
    else:
        out_ref[...] = res.astype(out_ref.dtype)


def gauss_policy_forward(obs, params, *, with_layer_norm=False,
                         log_sigma_min=None, log_sigma_max=None,
                         tile_b=512, param_dtype=jnp.bfloat16,
                         out_dtype=jnp.float32):
    """Runs the GaussPolicy forward pass. Returns (mu, sigma) — the parameters
    of the Normal distribution wrapped by GaussDist in the PyTorch module."""
    B, obs_dim = obs.shape
    action_dim = params["mu"][0].shape[1]

    # ---- host-side packing: pad widths, fuse heads, cast weights ----------
    def pad2d(a, rows, cols):
        return jnp.pad(a, ((0, rows - a.shape[0]), (0, cols - a.shape[1])))

    flat_inputs = []
    hidden_dims = []
    matmul_macs = 0
    in_dim = obs_dim
    for layer in params["hidden"]:
        w, b = layer[0], layer[1]
        h = w.shape[1]
        h_p = _round_up(h, _LANE)            # lane-dense vector ops everywhere
        w_p = pad2d(w, in_dim, h_p).astype(param_dtype)
        b_p = pad2d(b, 1, h_p)               # biases stay f32
        flat_inputs.extend([w_p, b_p])
        if with_layer_norm:
            flat_inputs.extend([pad2d(layer[2], 1, h_p),   # gamma (zero-padded)
                                pad2d(layer[3], 1, h_p)])  # beta  (zero-padded)
        hidden_dims.append((h, h_p))
        matmul_macs += in_dim * h_p
        in_dim = h_p

    # Fused (mu | std) head, zero-padded to a lane-dense output width.
    w_mu, b_mu = params["mu"]
    w_std, b_std = params["std"]
    head_pad = _round_up(2 * action_dim, _LANE)
    w_head = pad2d(jnp.concatenate([w_mu, w_std], axis=1), in_dim, head_pad)
    b_head = pad2d(jnp.concatenate([b_mu, b_std], axis=1), 1, head_pad)
    flat_inputs.extend([w_head.astype(param_dtype), b_head])
    matmul_macs += in_dim * head_pad

    # ---- batch tiling ------------------------------------------------------
    tile_b = max(_SUBLANE, _round_up(int(tile_b), _SUBLANE))
    tile_b = min(tile_b, _round_up(max(B, 1), _SUBLANE))
    # v7x has 2 TensorCores per chip: when the batch is big enough, cap the
    # tile so the "parallel" grid axis has >= 2 steps (harmless on v5e/v6e).
    if B > _SUBLANE:
        tile_b = min(tile_b, max(_SUBLANE, _round_up((B + 1) // 2, _SUBLANE)))
    b_pad = _round_up(B, tile_b)
    grid = (b_pad // tile_b,)

    # Stream obs in param_dtype (bf16 in production): halves obs DMA bytes and
    # removes the per-tile cast before the first matmul.
    obs_p = obs.astype(param_dtype)
    if b_pad != B:
        obs_p = jnp.pad(obs_p, ((0, b_pad - B), (0, 0)))

    _const_index = lambda i: (0, 0)          # weights resident across grid

    def _param_spec(shape):
        # Constant index_map -> fetched once; single-buffer so residents do
        # not pay 2x VMEM (matters for realistic hidden widths on v7x/v5e).
        try:
            return pl.BlockSpec(shape, _const_index,
                                pipeline_mode=pl.Buffered(1))
        except TypeError:                    # older jax without pipeline_mode
            return pl.BlockSpec(shape, _const_index)

    in_specs = [pl.BlockSpec((tile_b, obs_dim), lambda i: (i, 0))]
    in_specs += [_param_spec(tuple(a.shape)) for a in flat_inputs]
    out_specs = pl.BlockSpec((tile_b, head_pad), lambda i: (i, 0))

    sigma_lo = math.exp(log_sigma_min) if log_sigma_min is not None else None
    sigma_hi = math.exp(log_sigma_max) if log_sigma_max is not None else None

    kernel = functools.partial(
        _gauss_policy_kernel,
        hidden_dims=tuple(hidden_dims),
        with_layer_norm=with_layer_norm,
        action_dim=action_dim,
        sigma_lo=sigma_lo,
        sigma_hi=sigma_hi,
    )

    # ---- VMEM budget & cost hint -------------------------------------------
    param_bytes = int(sum(int(a.size) * a.dtype.itemsize for a in flat_inputs))
    obs_tile_bytes = tile_b * obs_dim * int(np.dtype(param_dtype).itemsize)
    out_tile_bytes = tile_b * head_pad * int(np.dtype(out_dtype).itemsize)
    max_width = max([obs_dim, head_pad] + [hp for (_, hp) in hidden_dims])
    act_bytes = 4 * tile_b * max_width * 4         # a few live f32 activations
    vmem_limit = 2 * (param_bytes + 2 * (obs_tile_bytes + out_tile_bytes)
                      + act_bytes)
    vmem_limit = int(min(max(vmem_limit, 8 << 20), 64 << 20))

    sig_start = (action_dim // _LANE) * _LANE
    flops = 2 * b_pad * matmul_macs
    transcendentals = (b_pad * (head_pad - sig_start) * 2
                       + (b_pad * len(hidden_dims) if with_layer_norm else 0))
    bytes_accessed = (int(obs_p.size) * obs_p.dtype.itemsize
                      + param_bytes
                      + b_pad * head_pad * int(np.dtype(out_dtype).itemsize))

    out = pl.pallas_call(
        kernel,
        out_shape=jax.ShapeDtypeStruct((b_pad, head_pad), out_dtype),
        grid=grid,
        in_specs=in_specs,
        out_specs=out_specs,
        compiler_params=pltpu.CompilerParams(
            dimension_semantics=("parallel",),
            vmem_limit_bytes=vmem_limit),
        cost_estimate=pl.CostEstimate(
            flops=int(flops),
            transcendentals=int(transcendentals),
            bytes_accessed=int(bytes_accessed)),
    )(obs_p, *flat_inputs)

    mu = out[:B, :action_dim]
    sigma = out[:B, action_dim:2 * action_dim]
    return mu, sigma


# ----------------------------- init & reference ------------------------------

def _init_linear(key, fan_in, fan_out):
    # Matches torch.nn.Linear default init: U(-1/sqrt(fan_in), 1/sqrt(fan_in))
    k = 1.0 / math.sqrt(fan_in)
    kw, kb = jax.random.split(key)
    w = jax.random.uniform(kw, (fan_in, fan_out), jnp.float32, -k, k)
    b = jax.random.uniform(kb, (1, fan_out), jnp.float32, -k, k)
    return w, b


def init_gauss_policy_params(key, obs_dim, action_dim, hiddens,
                             with_layer_norm=False):
    params = {"hidden": [], "mu": None, "std": None}
    in_dim = obs_dim
    for h in hiddens:
        key, sub = jax.random.split(key)
        w, b = _init_linear(sub, in_dim, h)
        layer = [w, b]
        if with_layer_norm:
            layer.append(jnp.ones((1, h), jnp.float32))   # gamma
            layer.append(jnp.zeros((1, h), jnp.float32))  # beta
        params["hidden"].append(tuple(layer))
        in_dim = h
    key, kmu, kstd = jax.random.split(key, 3)
    params["mu"] = _init_linear(kmu, in_dim, action_dim)
    params["std"] = _init_linear(kstd, in_dim, action_dim)
    return params


def _reference_forward(obs, params, with_layer_norm=False,
                       log_sigma_min=None, log_sigma_max=None):
    x = obs
    for layer in params["hidden"]:
        w, b = layer[0], layer[1]
        x = x @ w + b
        if with_layer_norm:
            g, beta = layer[2], layer[3]
            mean = jnp.mean(x, axis=-1, keepdims=True)
            var = jnp.mean((x - mean) ** 2, axis=-1, keepdims=True)
            x = (x - mean) / jnp.sqrt(var + 1e-5) * g + beta
        x = jnp.maximum(x, 0.0)
    mu = x @ params["mu"][0] + params["mu"][1]
    sigma = jax.nn.softplus(x @ params["std"][0] + params["std"][1])
    if log_sigma_min is not None and log_sigma_max is not None:
        sigma = jnp.clip(sigma, math.exp(log_sigma_min), math.exp(log_sigma_max))
    return mu, sigma


# TODO(synk): GaussDist / torch.distributions.Normal sampling is stateful RNG
# glue, not kernel compute; the kernel returns the distribution parameters
# (mu, sigma) exactly as the PyTorch forward produces them.
# TODO(synk): with_batch_norm (nn.BatchNorm1d running statistics) is not
# implemented; the module forbids combining it with LayerNorm anyway.

if __name__ == "__main__":
    obs_dim, action_dim = 32, 6
    hiddens = (64, 32)

    configs = [
        # (name, batch, with_ln, ls_min, ls_max, pdtype, odtype, tile_b, tol)
        ("plain_bf16_default_tile", 20, False, None, None,
         jnp.bfloat16, jnp.float32, 512, 5e-2),
        ("ln_clip_bf16",            20, True,  -2.0, 1.0,
         jnp.bfloat16, jnp.float32, 8,   5e-2),
        ("plain_clip_f32",           5, False, -2.0, 1.0,
         jnp.float32,  jnp.float32, 8,   2e-2),
        ("plain_clip_bf16_out",    300, False, -2.0, 1.0,
         jnp.bfloat16, jnp.bfloat16, 512, 8e-2),
    ]

    key = jax.random.PRNGKey(0)
    for (name, batch, with_ln, ls_min, ls_max,
         pdtype, odtype, tb, tol) in configs:
        key, k_obs, k_par = jax.random.split(key, 3)
        obs = jax.random.normal(k_obs, (batch, obs_dim), jnp.float32)
        params = init_gauss_policy_params(k_par, obs_dim, action_dim, hiddens,
                                          with_layer_norm=with_ln)

        mu, sigma = gauss_policy_forward(
            obs, params, with_layer_norm=with_ln,
            log_sigma_min=ls_min, log_sigma_max=ls_max,
            tile_b=tb, param_dtype=pdtype, out_dtype=odtype)
        jax.block_until_ready((mu, sigma))
        mu = mu.astype(jnp.float32)
        sigma = sigma.astype(jnp.float32)

        mu_ref, sigma_ref = _reference_forward(
            obs, params, with_layer_norm=with_ln,
            log_sigma_min=ls_min, log_sigma_max=ls_max)

        assert mu.shape == (batch, action_dim), (name, mu.shape)
        assert sigma.shape == (batch, action_dim), (name, sigma.shape)
        assert bool(jnp.all(sigma > 0.0)), name
        if ls_min is not None and ls_max is not None:
            eps = 2e-2 if odtype == jnp.bfloat16 else 1e-5
            assert bool(jnp.all(sigma >= math.exp(ls_min) - eps)), name
            assert bool(jnp.all(sigma <= math.exp(ls_max) + eps)), name
        assert jnp.allclose(mu, mu_ref, atol=tol, rtol=tol), name
        assert jnp.allclose(sigma, sigma_ref, atol=tol, rtol=tol), name

    print("KERNEL_OK")
</pallas_src>

<mosaic_0001>
module attributes {stable_mosaic.version = 11 : i64} {
  func.func @_gauss_policy_kernel(%arg0: i32, %arg1: memref<16x32xbf16, #tpu.memory_space<vmem>>, %arg2: memref<32x128xbf16, #tpu.memory_space<vmem>>, %arg3: memref<1x128xf32, #tpu.memory_space<vmem>>, %arg4: memref<128x128xbf16, #tpu.memory_space<vmem>>, %arg5: memref<1x128xf32, #tpu.memory_space<vmem>>, %arg6: memref<128x128xbf16, #tpu.memory_space<vmem>>, %arg7: memref<1x128xf32, #tpu.memory_space<vmem>>, %arg8: memref<16x128xf32, #tpu.memory_space<vmem>>) attributes {dimension_semantics = [#tpu.dimension_semantics<parallel>], iteration_bounds = array<i64: 2>, scalar_prefetch = 0 : i64, scratch_operands = 0 : i64, tpu.core_type = #tpu.core_type<tc>, window_params = [{transform_indices = @transform_0, window_bounds = array<i64: 16, 32>}, {pipeline_mode = #tpu.pipeline_mode<synchronous>, transform_indices = @transform_1, window_bounds = array<i64: 32, 128>}, {pipeline_mode = #tpu.pipeline_mode<synchronous>, transform_indices = @transform_2, window_bounds = array<i64: 1, 128>}, {pipeline_mode = #tpu.pipeline_mode<synchronous>, transform_indices = @transform_3, window_bounds = array<i64: 128, 128>}, {pipeline_mode = #tpu.pipeline_mode<synchronous>, transform_indices = @transform_4, window_bounds = array<i64: 1, 128>}, {pipeline_mode = #tpu.pipeline_mode<synchronous>, transform_indices = @transform_5, window_bounds = array<i64: 128, 128>}, {pipeline_mode = #tpu.pipeline_mode<synchronous>, transform_indices = @transform_6, window_bounds = array<i64: 1, 128>}, {transform_indices = @transform_7, window_bounds = array<i64: 16, 128>}]} {
    %c0 = arith.constant 0 : index
    %c0_0 = arith.constant 0 : index
    %0 = vector.load %arg1[%c0, %c0_0] : memref<16x32xbf16, #tpu.memory_space<vmem>>, vector<16x32xbf16>
    %c0_1 = arith.constant 0 : index
    %c0_2 = arith.constant 0 : index
    %1 = vector.load %arg2[%c0_1, %c0_2] : memref<32x128xbf16, #tpu.memory_space<vmem>>, vector<32x128xbf16>
    %cst = arith.constant dense<0.000000e+00> : vector<16x128xf32>
    %2 = tpu.matmul %0, %1, %cst {dimension_numbers = #tpu.dot_dimension_numbers<[1], [0], [0], [1], [0, 0, 1, 1], [], []>} : vector<16x32xbf16>, vector<32x128xbf16>, vector<16x128xf32> -> vector<16x128xf32>
    %c0_3 = arith.constant 0 : index
    %c0_4 = arith.constant 0 : index
    %3 = vector.load %arg3[%c0_3, %c0_4] : memref<1x128xf32, #tpu.memory_space<vmem>>, vector<1x128xf32>
    %4 = vector.broadcast %3 : vector<1x128xf32> to vector<16x128xf32>
    %5 = arith.addf %2, %4 : vector<16x128xf32>
    %cst_5 = arith.constant 0.000000e+00 : f32
    %6 = vector.broadcast %cst_5 : f32 to vector<16x128xf32>
    %7 = arith.maximumf %5, %6 : vector<16x128xf32>
    %8 = arith.truncf %7 : vector<16x128xf32> to vector<16x128xbf16>
    %c0_6 = arith.constant 0 : index
    %c0_7 = arith.constant 0 : index
    %9 = vector.load %arg4[%c0_6, %c0_7] : memref<128x128xbf16, #tpu.memory_space<vmem>>, vector<128x128xbf16>
    %cst_8 = arith.constant dense<0.000000e+00> : vector<16x128xf32>
    %10 = tpu.matmul %8, %9, %cst_8 {dimension_numbers = #tpu.dot_dimension_numbers<[1], [0], [0], [1], [0, 0, 1, 1], [], []>} : vector<16x128xbf16>, vector<128x128xbf16>, vector<16x128xf32> -> vector<16x128xf32>
    %c0_9 = arith.constant 0 : index
    %c0_10 = arith.constant 0 : index
    %11 = vector.load %arg5[%c0_9, %c0_10] : memref<1x128xf32, #tpu.memory_space<vmem>>, vector<1x128xf32>
    %12 = vector.broadcast %11 : vector<1x128xf32> to vector<16x128xf32>
    %13 = arith.addf %10, %12 : vector<16x128xf32>
    %cst_11 = arith.constant 0.000000e+00 : f32
    %14 = vector.broadcast %cst_11 : f32 to vector<16x128xf32>
    %15 = arith.maximumf %13, %14 : vector<16x128xf32>
    %16 = arith.truncf %15 : vector<16x128xf32> to vector<16x128xbf16>
    %c0_12 = arith.constant 0 : index
    %c0_13 = arith.constant 0 : index
    %17 = vector.load %arg6[%c0_12, %c0_13] : memref<128x128xbf16, #tpu.memory_space<vmem>>, vector<128x128xbf16>
    %cst_14 = arith.constant dense<0.000000e+00> : vector<16x128xf32>
    %18 = tpu.matmul %16, %17, %cst_14 {dimension_numbers = #tpu.dot_dimension_numbers<[1], [0], [0], [1], [0, 0, 1, 1], [], []>} : vector<16x128xbf16>, vector<128x128xbf16>, vector<16x128xf32> -> vector<16x128xf32>
    %c0_15 = arith.constant 0 : index
    %c0_16 = arith.constant 0 : index
    %19 = vector.load %arg7[%c0_15, %c0_16] : memref<1x128xf32, #tpu.memory_space<vmem>>, vector<1x128xf32>
    %20 = vector.broadcast %19 : vector<1x128xf32> to vector<16x128xf32>
    %21 = arith.addf %18, %20 : vector<16x128xf32>
    %cst_17 = arith.constant 0.000000e+00 : f32
    %22 = vector.broadcast %cst_17 : f32 to vector<16x128xf32>
    %23 = arith.maximumf %21, %22 : vector<16x128xf32>
    %24 = math.absf %21 : vector<16x128xf32>
    %cst_18 = arith.constant 0.000000e+00 : f32
    %25 = vector.broadcast %cst_18 : f32 to vector<16x128xf32>
    %26 = arith.subf %25, %24 : vector<16x128xf32>
    %27 = math.exp %26 : vector<16x128xf32>
    %28 = math.log1p %27 : vector<16x128xf32>
    %29 = arith.addf %23, %28 : vector<16x128xf32>
    %30 = tpu.iota {dimensions = array<i32: 1>} : vector<1x128xi32>
    %c0_i32 = arith.constant 0 : i32
    %31 = vector.broadcast %c0_i32 : i32 to vector<1x128xi32>
    %32 = arith.addi %30, %31 : vector<1x128xi32>
    %c6_i32 = arith.constant 6 : i32
    %33 = vector.broadcast %c6_i32 : i32 to vector<1x128xi32>
    %34 = arith.cmpi slt, %32, %33 : vector<1x128xi32>
    %35 = vector.shape_cast %34 : vector<1x128xi1> to vector<1x128xi1>
    %36 = vector.broadcast %35 : vector<1x128xi1> to vector<16x128xi1>
    %37 = arith.select %36, %21, %29 : vector<16x128xi1>, vector<16x128xf32>
    %c0_19 = arith.constant 0 : index
    %c0_20 = arith.constant 0 : index
    %38 = vector.load %arg8[%c0_19, %c0_20] : memref<16x128xf32, #tpu.memory_space<vmem>>, vector<16x128xf32>
    tpu.vector_store %arg8[%c0_19, %c0_20], %37 {strides = array<i32>} : memref<16x128xf32, #tpu.memory_space<vmem>>, vector<16x128xf32>,
    return
  }
  func.func @transform_0(%arg0: i32) -> (i32, i32) {
    %c0_i32 = arith.constant 0 : i32
    %c0_i32_0 = arith.constant 0 : i32
    return %arg0, %c0_i32 : i32, i32
  }
  func.func @transform_1(%arg0: i32) -> (i32, i32) {
    %c0_i32 = arith.constant 0 : i32
    %c0_i32_0 = arith.constant 0 : i32
    %c0_i32_1 = arith.constant 0 : i32
    return %c0_i32, %c0_i32_0 : i32, i32
  }
  func.func @transform_2(%arg0: i32) -> (i32, i32) {
    %c0_i32 = arith.constant 0 : i32
    %c0_i32_0 = arith.constant 0 : i32
    %c0_i32_1 = arith.constant 0 : i32
    return %c0_i32, %c0_i32_0 : i32, i32
  }
  func.func @transform_3(%arg0: i32) -> (i32, i32) {
    %c0_i32 = arith.constant 0 : i32
    %c0_i32_0 = arith.constant 0 : i32
    %c0_i32_1 = arith.constant 0 : i32
    return %c0_i32, %c0_i32_0 : i32, i32
  }
  func.func @transform_4(%arg0: i32) -> (i32, i32) {
    %c0_i32 = arith.constant 0 : i32
    %c0_i32_0 = arith.constant 0 : i32
    %c0_i32_1 = arith.constant 0 : i32
    return %c0_i32, %c0_i32_0 : i32, i32
  }
  func.func @transform_5(%arg0: i32) -> (i32, i32) {
    %c0_i32 = arith.constant 0 : i32
    %c0_i32_0 = arith.constant 0 : i32
    %c0_i32_1 = arith.constant 0 : i32
    return %c0_i32, %c0_i32_0 : i32, i32
  }
  func.func @transform_6(%arg0: i32) -> (i32, i32) {
    %c0_i32 = arith.constant 0 : i32
    %c0_i32_0 = arith.constant 0 : i32
    %c0_i32_1 = arith.constant 0 : i32
    return %c0_i32, %c0_i32_0 : i32, i32
  }
  func.func @transform_7(%arg0: i32) -> (i32, i32) {
    %c0_i32 = arith.constant 0 : i32
    %c0_i32_0 = arith.constant 0 : i32
    return %arg0, %c0_i32 : i32, i32
  }
}

</mosaic_0001>

<bundles_post_ra>
// kernel: tpu_custom_call.1
= control target key start
LH: loop header
LB: loop body
LE: loop exit
PB: predicated region body
PF: predicated region fallthrough
CT: control target
= control target key end

     0   :  { %12 = vsyncpa [#allocation3], 0  ;;  %s1574_s0 = inlined_call_operand.hbm [shape: bf16[32,32], index: 0, kind: input, shape index: {}]   ;;  %s1575_s1 = inlined_call_operand.hbm [shape: bf16[32,128], index: 1, kind: input, shape index: {}]   ;;  %s1576_s2 = inlined_call_operand.vmem [shape: f32[1,128], index: 2, kind: input, shape index: {}]   ;;  %s1577_s3 = inlined_call_operand.hbm [shape: bf16[128,128], index: 3, kind: input, shape index: {}]   ;;  %s1578_s4 = inlined_call_operand.vmem [shape: f32[1,128], index: 4, kind: input, shape index: {}]   ;;  %s1579_s5 = inlined_call_operand.hbm [shape: bf16[128,128], index: 5, kind: input, shape index: {}]   ;;  %s1580_s6 = inlined_call_operand.vmem [shape: f32[1,128], index: 6, kind: input, shape index: {}]   ;;  %s1581_s7 = inlined_call_operand.hbm [shape: f32[32,128], index: 7, kind: output, shape index: {}]  }
   0x1   :  { %14 = vsyncpa [#allocation3 + $0x1], 0 }
   0x2   :  { %15 = vsyncpa [#allocation6], 0 }
   0x3   :  { %16 = vsyncpa [#allocation9], 0 }
   0x4   :  { %17 = vsyncpa [#allocation4], 0 }
   0x5   :  { %19 = vsyncpa [#allocation4 + $0x1], 0  ;;  %s1269_s24 = smov 0   ;;  %s1271_s25 = smov 0  }
   0x6   :  { %s1273_s26 = smov 0   ;;  %s1275_s27 = smov 0  }
   0x7 LB: > { %s1290_s28 = sadd.s32 4294967295, %s1216_s27   ;;  %s804_s29 = sadd.s32 4294967294, %s1216_s27   ;;  %s1216_s27 = sphi %s1275_s27, %s1607_s27   ;;  %s1212_s26 = sphi %s1273_s26, %s1606_s26   ;;  %s1208_s25 = sphi %s1271_s25, %s1605_s25   ;;  %s1204_s24 = sphi %s1269_s24, %s1604_s24  }
   0x8   : > { %p45_p0 = scmp.ne.s32.totalorder %s1208_s25, %s1204_s24  ;;  %p1582_p1 = scmp.eq.s32.totalorder %s1290_s28, 0 }
   0x9   : > { %p201_p3 = scmp.eq.s32.totalorder %s804_s29, 1  ;;  %p805_p5 = scmp.ge.s32.totalorder %s1216_s27, 1 }
   0xa   : > { %p1299_p4 = por %p1582_p1, %p45_p0  ;;  %p208_p7 = scmp.lt.s32.totalorder %s1216_s27, 3 }
   0xb   : > { %p1304_p6 = por %p201_p3, %p45_p0  ;;  %s1218_s10 = smov [#allocation5]  }
   0xc   : > { %s1586_s30 = scalar_select %p1299_p4, 1, 0 }
   0xd   : > { %s1587_s8 = scalar_select %p1304_p6, 1, 0 }
   0xe   : > { %p1309_p8 = pnand %p805_p5, %p208_p7  ;;  %s220_s11 = sshll.u32 %s1218_s10, 4  ;;  %s1313_s11 = int_to_ptr.vmem [resolvable:$true] %s220_s11 }
   0xf   : > { %1588 = sst [smem:[#allocation15_spill]] %s1587_s8  ;;  %s1219_s13 = smov [#allocation7]  }
  0x10   : > { %s1589_s9 = scalar_select %p1309_p8, 1, 0 }
  0x11   : > { %p934_p9 = pneg %p1309_p8  ;;  %s236_s14 = sshll.u32 %s1219_s13, 4  ;;  %s1324_s14 = int_to_ptr.vmem [resolvable:$true] %s236_s14 }
  0x12   : > { %s1220_s15 = smov [#allocation8]   ;;  %s1028_s19 = scalar_lea.hbm %s1575_s1, 256 }
  0x13   : > { %p1320_p11 = pnand %p934_p9, %p1582_p1  ;;  %s1326_s16 = sshll.u32 %s1220_s15, 4  ;;  %s253_s16 = int_to_ptr.vmem [resolvable:$true] %s1326_s16 }
  0x14   : > { %p1029_p12 = scmp.ne.s32.totalorder %s1575_s1, %s1028_s19  ;;  %p1035_p5 = scmp.lt.u32.totalorder %s1028_s19, %s1575_s1 }
  0x15   : > { %p1336_p13 = pneg %p1320_p11 }
  0x17   : > { %p1031_p0 = pnand %p1336_p13, %p1029_p12 }
  0x19   : > { %p1032_p3 = pneg %p1031_p0 }
  0x1b   : > { %p1037_p7 = pnand %p1035_p5, %p1032_p3 }
  0x1d   : > { %1040 = shalt.err (!%p1037_p7)
}
  0x1e   : > { %s1041_s10 = scalar_lea.vmem %s1313_s11, 256  ;;  %p1049_p2 = scmp.lt.s32.totalorder %s1313_s11, %s1313_s11 }
  0x1f   : > { %p1042_p9 = scmp.ne.s32.totalorder %s1313_s11, %s1041_s10  ;;  %p1050_p6 = scmp.lt.s32.totalorder %s1041_s10, %s1041_s10 }
  0x21   : > { %p1044_p10 = pnand %p1042_p9, %p1336_p13  ;;  %p1051_p12 = por %p1050_p6, %p1049_p2 }
  0x23   : > { %p1045_p1 = pneg %p1044_p10 }
  0x25   : > { %p1052_p0 = pnand %p1051_p12, %p1045_p1 }
  0x27   : > { %1055 = shalt.err (!%p1052_p0)
}
  0x28   : > { %s1221_s13 = smov 64   ;;  %s1222_s15 = smov 4  }
  0x29   : > { %937 = dma.hbm_to_vmem [thread:$0]  (!%p1320_p11), %s1575_s1, 256, %s1313_s11, [#allocation6], %s1221_s13, %s1221_s13, %s1222_s15  }
  0x2a   : > { %s1056_s21 = scalar_lea.hbm %s1577_s3, 1024 }
  0x2b   : > { %p1057_p1 = scmp.ne.s32.totalorder %s1577_s3, %s1056_s21  ;;  %p1063_p10 = scmp.lt.u32.totalorder %s1056_s21, %s1577_s3 }
  0x2d   : > { %p1059_p2 = pnand %p1057_p1, %p1336_p13 }
  0x2f   : > { %p1060_p6 = pneg %p1059_p2 }
  0x31   : > { %p1065_p3 = pnand %p1063_p10, %p1060_p6 }
  0x33   : > { %1068 = shalt.err (!%p1065_p3)
}
  0x34   : > { %s1069_s11 = scalar_lea.vmem %s1324_s14, 1024  ;;  %p1077_p12 = scmp.lt.s32.totalorder %s1324_s14, %s1324_s14 }
  0x35   : > { %p1070_p5 = scmp.ne.s32.totalorder %s1324_s14, %s1069_s11  ;;  %p1078_p0 = scmp.lt.s32.totalorder %s1069_s11, %s1069_s11 }
  0x37   : > { %p1072_p7 = pnand %p1070_p5, %p1336_p13  ;;  %p1079_p1 = por %p1078_p0, %p1077_p12 }
  0x39   : > { %p1073_p9 = pneg %p1072_p7 }
  0x3b   : > { %p1080_p2 = pnand %p1079_p1, %p1073_p9 }
  0x3d   : > { %1083 = shalt.err (!%p1080_p2)
}
  0x3e   : > { %940 = dma.hbm_to_vmem [thread:$0]  (!%p1320_p11), %s1577_s3, 1024, %s1324_s14, [#allocation6], %s1221_s13, %s1221_s13, %s1222_s15  }
  0x3f   : > { %s1084_s20 = scalar_lea.hbm %s1579_s5, 1024 }
  0x40   : > { %p1085_p6 = scmp.ne.s32.totalorder %s1579_s5, %s1084_s20  ;;  %p1091_p5 = scmp.lt.u32.totalorder %s1084_s20, %s1579_s5 }
  0x42   : > { %p1087_p10 = pnand %p1085_p6, %p1336_p13 }
  0x44   : > { %p1088_p3 = pneg %p1087_p10 }
  0x46   : > { %p1093_p7 = pnand %p1091_p5, %p1088_p3 }
  0x48   : > { %1096 = shalt.err (!%p1093_p7)
}
  0x49   : > { %s1097_s11 = scalar_lea.vmem %s253_s16, 1024  ;;  %p1105_p1 = scmp.lt.s32.totalorder %s253_s16, %s253_s16 }
  0x4a   : > { %p1098_p9 = scmp.ne.s32.totalorder %s253_s16, %s1097_s11  ;;  %p1106_p2 = scmp.lt.s32.totalorder %s1097_s11, %s1097_s11 }
  0x4c   : > { %p1100_p12 = pnand %p1098_p9, %p1336_p13  ;;  %p1107_p4 = por %p1106_p2, %p1105_p1 }
  0x4e   : > { %p1101_p0 = pneg %p1100_p12 }
  0x50   : > { %p1108_p8 = pnand %p1107_p4, %p1101_p0 }
  0x52   : > { %1111 = shalt.err (!%p1108_p8)
}
  0x53   : > { %943 = dma.hbm_to_vmem [thread:$0]  (!%p1320_p11), %s1579_s5, 1024, %s253_s16, [#allocation9], %s1221_s13, %s1221_s13, %s1222_s15  }
  0x54   : > { %s1409_s22 = sadd.s32 1, %s1216_s27   ;;  %s32_s17 = sadd.s32 1, %s1212_s26 }
  0x55   : > { %s29_s12 = ssub.s32 %s1216_s27, %s1409_s22  ;;  %p39_p8 = scmp.ne.s32.totalorder %s1212_s26, %s1208_s25 }
  0x56   : > { %p30_p4 = scmp.eq.s32.totalorder %s29_s12, 0  ;;  %p40_p13 = scmp.eq.s32.totalorder %s1216_s27, 0 }
  0x57   : > { %p955_p6 = scmp.lt.s32.totalorder %s1216_s27, 2  ;;  %p1592_p3 = scmp.eq.s32.totalorder %s1290_s28, 1 }
  0x58   : > { %s1419_s18 = scalar_select %p30_p4, %s1212_s26, %s32_s17  }
  0x59   : > { %p41_p10 = por %p40_p13, %p39_p8  ;;  %p1423_p5 = por %p1592_p3, %p39_p8 }
  0x5a   : > { %s269_s20 = sand.u32 1, %s1212_s26   ;;  %s847_s21 = sshll.u32 %s1216_s27, 7 }
  0x5b   : > { %s810_s16 = sshll.u32 %s269_s20, 3  ;;  %s1432_s10 = scalar_lea.hbm %s1574_s0, %s847_s21 }
  0x5c   : > { %s273_s11 = scalar_lea.vmem [#allocation2], %s810_s16  ;;  %p1434_p11 = pnand %p955_p6, %p41_p10 }
  0x5d   : > { %s280_s14 = sshll.u32 %s273_s11, 4  ;;  %s1440_s12 = scalar_lea.sflag [#allocation3], %s269_s20  ;;  %s1438_s14 = int_to_ptr.vmem [resolvable:$true] %s280_s14 }
  0x5e   : > { %s1112_s17 = scalar_lea.hbm %s1432_s10, 128  ;;  %p1114_p9 = pneg %p1434_p11 }
  0x5f   : > { %p1113_p7 = scmp.ne.s32.totalorder %s1432_s10, %s1112_s17  ;;  %s1117_s23 = scalar_lea.hbm %s1574_s0, 256 }
  0x60   : > { %p1118_p1 = scmp.lt.u32.totalorder %s1432_s10, %s1574_s0  ;;  %p1119_p2 = scmp.lt.u32.totalorder %s1117_s23, %s1112_s17 }
  0x61   : > { %p1115_p12 = pnand %p1114_p9, %p1113_p7  ;;  %p1121_p8 = scmp.lt.u32.totalorder %s1112_s17, %s1432_s10 }
  0x62   : > { %p1120_p4 = por %p1119_p2, %p1118_p1 }
  0x63   : > { %p1116_p0 = pneg %p1115_p12 }
  0x64   : > { %p1122_p13 = por %p1121_p8, %p1120_p4 }
  0x66   : > { %p1123_p6 = pnand %p1122_p13, %p1116_p0 }
  0x68   : > { %1126 = shalt.err (!%p1123_p6)
}
  0x69   : > { %s1127_s20 = scalar_lea.vmem %s1438_s14, 128  ;;  %s1223_s21 = smov [#allocation2]  }
  0x6a   : > { %p1128_p10 = scmp.ne.s32.totalorder %s1438_s14, %s1127_s20  ;;  %s1132_s16 = sshll.u32 %s1223_s21, 4  ;;  %s1133_s16 = int_to_ptr.vmem [resolvable:$false] %s1132_s16 }
  0x6b   : > { %s1134_s29 = scalar_lea.vmem %s1133_s16, 256  ;;  %p1135_p12 = scmp.lt.s32.totalorder %s1438_s14, %s1133_s16 }
  0x6c   : > { %p1130_p3 = pnand %p1128_p10, %p1114_p9  ;;  %p1136_p1 = scmp.lt.s32.totalorder %s1134_s29, %s1127_s20 }
  0x6e   : > { %p1131_p7 = pneg %p1130_p3  ;;  %p1137_p2 = por %p1136_p1, %p1135_p12 }
  0x70   : > { %p1138_p4 = pnand %p1137_p2, %p1131_p7 }
  0x72   : > { %1141 = shalt.err (!%p1138_p4)
}
  0x73   : > { %947 = dma.hbm_to_vmem [thread:$0]  (!%p1434_p11), %s1432_s10, 128, %s1438_s14, %s1440_s12, %s1221_s13, %s1221_s13, %s1222_s15  }
  0x74   : > { %p1595_p9 = scmp.ne.s32.totalorder %s1589_s9, 0 }
  0x75   : > { %s1474_s17 = sand.u32 (!%p1595_p9), 1, %s1208_s25   ;;  %p1596_p0 = scmp.ne.s32.totalorder (!%p1595_p9), %s1586_s30, 0 }
  0x76   : > { %292 = sbr.rel (%p1595_p9) target bundleno = 849 (0x351), region = 48  ;;  %s814_s23 = sshll.u32 (!%p1595_p9), %s1474_s17, 3 }
  0x77   : > { %s295_s11 = scalar_lea.sflag (!%p1595_p9), [#allocation3], %s1474_s17  ;;  %s298_s20 = scalar_lea.vmem (!%p1595_p9), [#allocation2], %s814_s23 }
  0x7d   : > { %1187 = dma.done.wait (%p1596_p0), %s295_s11, 128  }
  0x7e   : > { %1189 = vsyncadd (%p1596_p0), %s295_s11, 4294967168  ;;  %p1597_p8 = scmp.eq.s32.totalorder %s1290_s28, 0 }
  0x80   : > { %1191 = dma.done.wait (%p1597_p8), [#allocation6], 1280   ;;  %p1598_p11 = pmov %p1597_p8 }
  0x81   : > { %p1599_p13 = pmov %p1597_p8 }
  0x82   : > { %1193 = vsyncadd (%p1598_p11), [#allocation6], 4294966016 }
  0x83   : > { %1195 = dma.done.wait (%p1599_p13), [#allocation9], 1024   ;;  %p1600_p6 = pmov %p1597_p8 }
  0x84   : > { %v1224_v0 = vmov 0.0   ;;  %vm1225_vm0 = vmmov 0   ;;  %v1001_v1 = vld [vmem:[#allocation5] sm:$0xff]   ;;  %v1002_v2 = vld [vmem:[#allocation5 + $0x8] sm:$0xff]   ;;  %v1004_v3 = vld [vmem:[#allocation7] sm:$0xff]   ;;  %vm374_vm1 = vcmask 261120   ;;  %v679_v58 = vlaneseq }
  0x85   : > { %1197 = vsyncadd (%p1600_p6), [#allocation9], 4294966272  ;;  %870 = vmatprep.subr.bf16.mxu0 %v1224_v0  ;;  %874 = vmatprep.mubr.msk.bf16.mxu0 %vm1225_vm0, %v1224_v0  ;;  %v1003_v4 = vld [vmem:[%s298_s20] sm:$0xff]   ;;  %v1006_v6 = vld [vmem:[#allocation7 + $0x10] sm:$0xff]   ;;  %s818_s8 = sshll.u32 %s1474_s17, 4  ;;  %s848_s16 = sshll.u32 %s1290_s28, 8 }
  0x86   : > { %878 = vmatprep.subr.bf16.mxu1 %v1224_v0  ;;  %894 = vmatprep.mubr.msk.bf16.mxu1 %vm1225_vm0, %v1224_v0  ;;  %v1005_v5 = vld [vmem:[#allocation7 + $0x8] sm:$0xff]   ;;  %v1007_v7 = vld [vmem:[#allocation7 + $0x18] sm:$0xff]   ;;  %v1008_v8 = vld [vmem:[#allocation7 + $0x20] sm:$0xff]   ;;  %v680_v62 = vand.u32 127, %v679_v58  ;;  %s340_s12 = scalar_lea.vmem [#allocation10], %s818_s8  ;;  %s1530_s11 = scalar_lea.hbm %s1581_s7, %s848_s16 }
  0x87   : > { %871 = vmatpush3.bf16.msra.mxu0 %v1001_v1  ;;  %879 = vmatpush3.bf16.msra.mxu1 %v1004_v3  ;;  %v1009_v9 = vld [vmem:[#allocation7 + $0x28] sm:$0xff]   ;;  %v1010_v10 = vld [vmem:[#allocation7 + $0x30] sm:$0xff]   ;;  %v1011_v11 = vld [vmem:[#allocation7 + $0x38] sm:$0xff]   ;;  %s702_s21 = sshll.u32 %s340_s12, 4  ;;  %s689_s28 = scalar_lea.sflag [#allocation4], %s1474_s17  ;;  %s1525_s21 = int_to_ptr.vmem [resolvable:$true] %s702_s21 }
  0x88   : > { %872 = vmatprep.subr.bf16.mxu0 %v1224_v0  ;;  %880 = vmatprep.subr.bf16.mxu1 %v1224_v0  ;;  %v1012_v12 = vld [vmem:[#allocation8] sm:$0xff]   ;;  %v1013_v13 = vld [vmem:[#allocation8 + $0x8] sm:$0xff]   ;;  %v1014_v14 = vld [vmem:[#allocation8 + $0x10] sm:$0xff]   ;;  %vm681_vm3 = vcmp.lt.s32.totalorder %v680_v62, 6  ;;  %s1142_s20 = scalar_lea.vmem %s1525_s21, 256  ;;  %s1226_s30 = smov [#allocation10]  }
  0x89   : > { %v1015_v15 = vld [vmem:[#allocation8 + $0x18] sm:$0xff]   ;;  %v1016_v16 = vld [vmem:[#allocation8 + $0x20] sm:$0xff]   ;;  %v1017_v17 = vld [vmem:[#allocation8 + $0x28] sm:$0xff]   ;;  %p1143_p10 = scmp.ne.s32.totalorder %s1525_s21, %s1142_s20  ;;  %s1146_s9 = sshll.u32 %s1226_s30, 4  ;;  %s1147_s9 = int_to_ptr.vmem [resolvable:$false] %s1146_s9 }
  0x8a   : > { %v819_v18 = vld [vmem:[%s1576_s2] ss:$0 sm:$0xff]  ;;  %v1018_v28 = vld [vmem:[#allocation8 + $0x30] sm:$0xff]   ;;  %v1019_v29 = vld [vmem:[#allocation8 + $0x38] sm:$0xff]   ;;  %s1148_s13 = scalar_lea.vmem %s1147_s9, 512  ;;  %p1149_p12 = scmp.lt.s32.totalorder %s1525_s21, %s1147_s9 }
  0x8b   : > { %873 = vmatpush3.bf16.msra.mxu0 %v1002_v2  ;;  %881 = vmatpush3.bf16.msra.mxu1 %v1005_v5  ;;  %v824_v30 = vld [vmem:[%s1578_s4] ss:$0 sm:$0xff]  ;;  %p1144_p3 = pnand %p1143_p10, %p1423_p5  ;;  %p1150_p1 = scmp.lt.s32.totalorder %s1148_s13, %s1142_s20 }
  0x8c   : > { %898 = vmatprep.subr.bf16.mxu0 %v1224_v0  ;;  %882 = vmatprep.subr.bf16.mxu1 %v1224_v0  ;;  %v833_v40 = vld [vmem:[%s1580_s6] ss:$0 sm:$0xff] }
  0x8d   : > { %p1145_p7 = pneg %p1144_p3  ;;  %p1151_p2 = por %p1150_p1, %p1149_p12 }
  0x8e   : > { %875 = vmatmul.mubr.msk.bf16.vlgmr.msra.gmra.mrb[0].mxu0 %vm374_vm1, %v1003_v4 }
  0x8f   : > { %914 = vmatprep.mubr.msk.bf16.mxu0 %vm1225_vm0, %v1224_v0  ;;  %883 = vmatpush3.bf16.msra.mxu1 %v1006_v6  ;;  %p1152_p4 = pnand %p1151_p2, %p1145_p7 }
  0x90   : > { %884 = vmatprep.subr.bf16.mxu1 %v1224_v0  ;;  %899 = vmatpush3.bf16.msra.mxu0 %v1012_v12 }
  0x91   : > { %900 = vmatprep.subr.bf16.mxu0 %v1224_v0 }
  0x93   : > { %885 = vmatpush3.bf16.msra.mxu1 %v1007_v7 }
  0x94   : > { %886 = vmatprep.subr.bf16.mxu1 %v1224_v0  ;;  %901 = vmatpush3.bf16.msra.mxu0 %v1013_v13 }
  0x95   : > { %902 = vmatprep.subr.bf16.mxu0 %v1224_v0 }
  0x97   : > { %887 = vmatpush3.bf16.msra.mxu1 %v1008_v8 }
  0x98   : > { %888 = vmatprep.subr.bf16.mxu1 %v1224_v0  ;;  %903 = vmatpush3.bf16.msra.mxu0 %v1014_v14 }
  0x99   : > { %904 = vmatprep.subr.bf16.mxu0 %v1224_v0 }
  0x9b   : > { %889 = vmatpush3.bf16.msra.mxu1 %v1009_v9 }
  0x9c   : > { %890 = vmatprep.subr.bf16.mxu1 %v1224_v0  ;;  %905 = vmatpush3.bf16.msra.mxu0 %v1015_v15 }
  0x9d   : > { %906 = vmatprep.subr.bf16.mxu0 %v1224_v0 }
  0x9f   : > { %891 = vmatpush3.bf16.msra.mxu1 %v1010_v10 }
  0xa0   : > { %892 = vmatprep.subr.bf16.mxu1 %v1224_v0  ;;  %907 = vmatpush3.bf16.msra.mxu0 %v1016_v16 }
  0xa1   : > { %908 = vmatprep.subr.bf16.mxu0 %v1224_v0 }
  0xa3   : > { %893 = vmatpush3.bf16.msra.mxu1 %v1011_v11 }
  0xa4   : > { %909 = vmatpush3.bf16.msra.mxu0 %v1017_v17 }
  0xa5   : > { %910 = vmatprep.subr.bf16.mxu0 %v1224_v0 }
  0xa8   : > { %911 = vmatpush3.bf16.msra.mxu0 %v1018_v28 }
  0xa9   : > { %912 = vmatprep.subr.bf16.mxu0 %v1224_v0 }
  0xac   : > { %913 = vmatpush3.bf16.msra.mxu0 %v1019_v29 }
 0x161   : > { %v412_v19 = vpop.f32.mrb[0].mxu0 }
 0x162   : > { %v413_v20 = vadd.f32 %v819_v18, %v412_v19  ;;  %v876_v21 = vpop.f32.mrb[1].mxu0 }
 0x163   : > { %v415_v22 = vpop.f32.mrb[2].mxu0 }
 0x164   : > { %v416_v23 = vadd.f32 %v819_v18, %v415_v22  ;;  %v877_v24 = vpop.f32.mrb[3].mxu0  ;;  %v419_v25 = vmax.f32 %v413_v20, 0.0 }
 0x166   : > { %v420_v26 = vmax.f32 %v416_v23, 0.0 }
 0x168   : > { %v421_v27 = vpack.c.bf16 %v420_v26, %v419_v25 }
 0x16a   : > { %895 = vmatmul.mubr.bf16.vlgmr.msra.gmra.mrb[0].mxu1 %v421_v27 }
 0x23d   : > { %v527_v31 = vpop.f32.mrb[0].mxu1 }
 0x23e   : > { %v528_v32 = vadd.f32 %v824_v30, %v527_v31  ;;  %v896_v33 = vpop.f32.mrb[1].mxu1 }
 0x23f   : > { %v530_v34 = vpop.f32.mrb[2].mxu1 }
 0x240   : > { %v531_v35 = vadd.f32 %v824_v30, %v530_v34  ;;  %v897_v36 = vpop.f32.mrb[3].mxu1  ;;  %v534_v37 = vmax.f32 %v528_v32, 0.0 }
 0x242   : > { %v535_v38 = vmax.f32 %v531_v35, 0.0 }
 0x244   : > { %v536_v39 = vpack.c.bf16 %v535_v38, %v534_v37 }
 0x246   : > { %915 = vmatmul.mubr.bf16.vlgmr.msra.gmra.mrb[4].mxu0 %v536_v39 }
 0x319   : > { %v642_v41 = vpop.f32.mrb[4].mxu0 }
 0x31a   : > { %v643_v42 = vadd.f32 %v833_v40, %v642_v41  ;;  %v916_v43 = vpop.f32.mrb[5].mxu0 }
 0x31b   : > { %v645_v44 = vpop.f32.mrb[6].mxu0 }
 0x31c   : > { %v651_v45 = vand.u32 2147483647, %v643_v42  ;;  %v646_v46 = vadd.f32 %v833_v40, %v645_v44  ;;  %v917_v47 = vpop.f32.mrb[7].mxu0  ;;  %v649_v5 = vmax.f32 %v643_v42, 0.0 }
 0x31e   : > { %v653_v48 = vsub.f32 0.0, %v651_v45  ;;  %v652_v49 = vand.u32 2147483647, %v646_v46  ;;  %v650_v10 = vmax.f32 %v646_v46, 0.0 }
 0x320   : > { %v655_v50 = vmul.f32 1.442695, %v653_v48  ;;  %v654_v51 = vsub.f32 0.0, %v652_v49 }
 0x322   : > { %1020 = vpow2.f32 %v655_v50  ;;  %v657_v52 = vmul.f32 1.442695, %v654_v51 }
 0x324   : > { %1022 = vpow2.f32 %v657_v52 }
 0x32c   : > { %v1021_v53 = vpop.eup %1020 }
 0x32d   : > { %v659_v54 = vadd.f32 1.0, %v1021_v53  ;;  %v662_v57 = vmul.f32 -0.5, %v1021_v53  ;;  %v665_v61 = vand.u32 2147483647, %v1021_v53 }
 0x32e   : > { %v1023_v55 = vpop.eup %1022 }
 0x32f   : > { %1024 = vlog2.f32 %v659_v54  ;;  %v668_v56 = vadd.f32 1.0, %v1023_v55  ;;  %v671_v59 = vmul.f32 -0.5, %v1023_v55  ;;  %v663_v60 = vadd.f32 1.0, %v662_v57 }
 0x330   : > { %v674_v1 = vand.u32 2147483647, %v1023_v55  ;;  %vm666_vm2 = vcmp.lt.f32.partialorder %v665_v61, 0.0004427343 }
 0x331   : > { %1026 = vlog2.f32 %v668_v56  ;;  %v672_v63 = vadd.f32 1.0, %v671_v59  ;;  %v664_v3 = vmul.f32 %v1021_v53, %v663_v60 }
 0x332   : > { %vm675_vm4 = vcmp.lt.f32.partialorder %v674_v1, 0.0004427343 }
 0x333   : > { %v673_v8 = vmul.f32 %v1023_v55, %v672_v63 }
 0x339   : > { %v1025_v0 = vpop.eup %1024 }
 0x33a   : > { %v661_v2 = vmul.f32 0.6931472, %v1025_v0 }
 0x33b   : > { %v1027_v4 = vpop.eup %1026 }
 0x33c   : > { %v667_v6 = vsel %vm666_vm2, %v664_v3, %v661_v2  ;;  %v670_v7 = vmul.f32 0.6931472, %v1027_v4 }
 0x33d   : > { %v677_v9 = vadd.f32 %v667_v6, %v649_v5 }
 0x33e   : > { %v676_v11 = vsel %vm675_vm4, %v673_v8, %v670_v7 }
 0x33f   : > { %v684_v12 = vsel %vm681_vm3, %v643_v42, %v677_v9  ;;  %v678_v13 = vadd.f32 %v676_v11, %v650_v10 }
 0x340   : > { %686 = vst [vmem:[%s340_s12] sm:$0xff] %v684_v12 }
 0x341   : > { %v685_v14 = vsel %vm681_vm3, %v646_v46, %v678_v13 }
 0x342   : > { %687 = vst [vmem:[%s340_s12 + $0x8] sm:$0xff] %v685_v14 }
 0x343   : > { %1155 = shalt.err (!%p1152_p4)
}
 0x344   : > { %s1156_s15 = scalar_lea.hbm %s1530_s11, 256  ;;  %s1160_s8 = scalar_lea.hbm %s1581_s7, 512 }
 0x345   : > { %p1157_p9 = scmp.ne.s32.totalorder %s1530_s11, %s1156_s15  ;;  %p1161_p11 = scmp.lt.u32.totalorder %s1530_s11, %s1581_s7 }
 0x346   : > { %p1162_p13 = scmp.lt.u32.totalorder %s1160_s8, %s1156_s15  ;;  %p1164_p10 = scmp.lt.u32.totalorder %s1156_s15, %s1530_s11 }
 0x347   : > { %p1158_p0 = pnand %p1157_p9, %p1423_p5 }
 0x348   : > { %p1163_p6 = por %p1162_p13, %p1161_p11 }
 0x349   : > { %p1159_p8 = pneg %p1158_p0 }
 0x34a   : > { %p1165_p3 = por %p1164_p10, %p1163_p6 }
 0x34c   : > { %p1166_p7 = pnand %p1165_p3, %p1159_p8 }
 0x34e   : > { %1169 = shalt.err (!%p1166_p7)
}
 0x34f   : > { %s1227_s29 = smov 128   ;;  %s1228_s23 = smov 8  }
 0x350   : > { %932 = dma.vmem_to_hbm [thread:$0]  (%p1423_p5), %s1525_s21, 256, %s1530_s11, %s689_s28, %s1227_s29, %s1227_s29, %s1228_s23  }
 0x351 PF: > { %s1601_s20 = sld [smem:[#allocation15_spill]]  ;;  %s717_s30 = sand.u32 1, %s1204_s24  }
 0x352   : > { %p1603_p1 = scmp.ge.s32.totalorder %s1216_s27, 2  ;;  %s718_s9 = scalar_lea.sflag [#allocation4], %s717_s30 }
 0x357   : > { %p1602_p12 = scmp.ne.s32.totalorder %s1601_s20, 0 }
 0x359   : > { %p949_p2 = pnand %p1603_p1, %p1602_p12 }
 0x35b   : > { %1199 = dma.done.wait (!%p949_p2), %s718_s9, 256  }
 0x35c   : > { %1201 = vsyncadd (!%p949_p2), %s718_s9, 4294967040  ;;  %p22_p4 = scmp.ge.s32.totalorder %s1409_s22, 4   ;;  %s1604_s24 = smov %s1208_s25 }
 0x35d   : > { %s1605_s25 = smov %s1212_s26  ;;  %s1606_s26 = smov %s1419_s18 }
 0x35e   : > { %s1607_s27 = smov %s1409_s22  ;;  %24 = sbr.rel (!%p22_p4) target bundleno = 7 (0x7), region = 105 }
 0x365   :  { %723 = vsyncpa [#allocation3], 1 }
 0x366   :  { %725 = vsyncpa [#allocation3 + $0x1], 1 }
 0x367   :  { %726 = vsyncpa [#allocation6], 1 }
 0x368   :  { %727 = vsyncpa [#allocation9], 1 }
 0x369   :  { %728 = vsyncpa [#allocation4], 1 }
 0x36a   :  { %730 = vsyncpa [#allocation4 + $0x1], 1 }

</bundles_post_ra>
